<compile_context>
chip_gen: v7x
topology: tpu7x:2x2x1
jax: 0.10.0
libtpu: 0.0.40
codegen_flags: <defaults>
</compile_context>

<pallas_src>
import jax
import jax.numpy as jnp
from jax.experimental import pallas as pl
from jax.experimental.pallas import tpu as pltpu

_LANES = 128
_FEATURES = 3


def _round_up(v: int, m: int) -> int:
    return (v + m - 1) // m * m


def _linear_kernel(bias_ref, wsel_ref, x_ref, o_ref):
    # bias_ref: (1,) f32 in SMEM
    # wsel_ref: (384, 128) f32 in VMEM, resident across grid steps
    # x_ref:    (TILE_R, 384) f32 tile -- 128 interleaved samples per row
    # o_ref:    (TILE_R, 128) f32 tile -- lane-dense output slab
    o_ref[...] = (
        jnp.dot(x_ref[...], wsel_ref[...], preferred_element_type=jnp.float32)
        + bias_ref[0]
    )


def classifier_synthetic_forward(x, weight, bias, *, tile_rows=1024,
                                 small_n_threshold=4096):
    """Forward pass of Classifier_synthetic (nn.Linear(3, 1)).

    Args:
        x: (..., 3) float input.
        weight: (1, 3) float, PyTorch nn.Linear weight layout (out, in).
        bias: (1,) float.
        tile_rows: rows of the (N/128, 384) reshaped input per grid step
            (1 row = 128 samples).  Sweep 256..2048; VMEM stays tiny.
        small_n_threshold: below this batch size use plain XLA instead of the
            Pallas kernel.

    Returns:
        (..., 1) float32 predictions.
    """
    orig_lead = x.shape[:-1]
    x = x.astype(jnp.float32).reshape(-1, _FEATURES)
    n = x.shape[0]
    w = weight.reshape(_FEATURES).astype(jnp.float32)
    b = bias.reshape(1).astype(jnp.float32)

    # ---- small-N fast path: launch/pad/reshape overhead would dominate. ----
    if n < small_n_threshold:
        y = x @ w.reshape(_FEATURES, 1) + b[0]
        return y.reshape(orig_lead + (1,))

    # ---- Pallas path --------------------------------------------------------
    # Pad rows up to a multiple of 128 only when ragged (padded rows evaluate
    # to the bias and are sliced off below).
    n128 = _round_up(n, _LANES)
    if n128 != n:
        x = jnp.pad(x, ((0, n128 - n), (0, 0)))

    r = n128 // _LANES
    # Free, contiguous reshape: row i holds samples [128*i, 128*(i+1)) with
    # their 3 features interleaved along the 384 lanes.
    x_rs = x.reshape(r, _FEATURES * _LANES)

    # Selection-weight matrix: wsel[3*j + k, j] = w[k]; everything else 0.
    # (x_rs @ wsel)[i, j] = sum_k x[128*i + j, k] * w[k].
    wsel = jnp.kron(jnp.eye(_LANES, dtype=jnp.float32),
                    w.reshape(_FEATURES, 1))          # (384, 128)

    # Tile sizing: multiple of 8 sublanes; ensure >= 2 grid steps when the
    # input allows (v7x dual-TensorCore sharding of the "parallel" axis).
    tile_r = max(8, int(tile_rows) // 8 * 8)
    if r > 8:
        tile_r = min(tile_r, _round_up(-(-r // 2), 8))
    if tile_r >= r:
        tile_r = r
    grid = (pl.cdiv(r, tile_r),)   # partial trailing block handled by Pallas

    out = pl.pallas_call(
        _linear_kernel,
        out_shape=jax.ShapeDtypeStruct((r, _LANES), jnp.float32),
        grid_spec=pltpu.PrefetchScalarGridSpec(
            num_scalar_prefetch=0,
            grid=grid,
            in_specs=[
                # bias: scalar in SMEM
                pl.BlockSpec(memory_space=pltpu.MemorySpace.SMEM),
                # selection-weight matrix: constant index_map -> fetched once,
                # resident in VMEM for all grid steps
                pl.BlockSpec((_FEATURES * _LANES, _LANES), lambda i: (0, 0)),
                # input slab
                pl.BlockSpec((tile_r, _FEATURES * _LANES), lambda i: (i, 0)),
            ],
            out_specs=pl.BlockSpec((tile_r, _LANES), lambda i: (i, 0)),
        ),
        compiler_params=pltpu.CompilerParams(
            dimension_semantics=("parallel",),
        ),
    )(b, wsel, x_rs)

    y = out.reshape(n128)
    if n128 != n:
        y = y[:n]
    return y.reshape(orig_lead + (1,))


def init_params(key):
    """Deterministic parameter init mimicking nn.Linear(3, 1) shapes."""
    k_w, k_b = jax.random.split(key)
    fan_in = float(_FEATURES)
    bound = 1.0 / jnp.sqrt(fan_in)
    weight = jax.random.uniform(k_w, (1, _FEATURES), jnp.float32, -bound, bound)
    bias = jax.random.uniform(k_b, (1,), jnp.float32, -bound, bound)
    return weight, bias


if __name__ == "__main__":
    key = jax.random.PRNGKey(0)
    k_x1, k_x2, k_x3, k_p = jax.random.split(key, 4)
    weight, bias = init_params(k_p)

    # Tolerance: f32 everywhere; loose enough to be robust to MXU f32
    # multi-pass rounding, tight enough to catch any indexing/weight bug.
    atol = rtol = 1e-3

    # 1) Tiny batch -> XLA fast path (matches the module's typical usage).
    x1 = jax.random.normal(k_x1, (8, _FEATURES), jnp.float32)
    o1 = jax.block_until_ready(classifier_synthetic_forward(x1, weight, bias))
    r1 = x1 @ weight.T + bias
    assert o1.shape == (8, 1)
    assert jnp.allclose(o1, r1, atol=atol, rtol=rtol)

    # 2) Pallas path: N a multiple of 128, multi-step grid + partial last block.
    x2 = jax.random.normal(k_x2, (6400, _FEATURES), jnp.float32)
    o2 = jax.block_until_ready(classifier_synthetic_forward(x2, weight, bias))
    r2 = x2 @ weight.T + bias
    assert o2.shape == (6400, 1)
    assert jnp.allclose(o2, r2, atol=atol, rtol=rtol)

    # 3) Pallas path: ragged N -> pad-to-128, partial trailing block, [:n] slice.
    x3 = jax.random.normal(k_x3, (6533, _FEATURES), jnp.float32)
    o3 = jax.block_until_ready(classifier_synthetic_forward(x3, weight, bias))
    r3 = x3 @ weight.T + bias
    assert o3.shape == (6533, 1)
    assert jnp.allclose(o3, r3, atol=atol, rtol=rtol)

    print("KERNEL_OK")
</pallas_src>

<mosaic_0001>
module attributes {stable_mosaic.version = 11 : i64} {
  func.func @_linear_kernel(%arg0: i32, %arg1: memref<1xf32, #tpu.memory_space<smem>>, %arg2: memref<384x128xf32, #tpu.memory_space<vmem>>, %arg3: memref<32x384xf32, #tpu.memory_space<vmem>>, %arg4: memref<32x128xf32, #tpu.memory_space<vmem>>) attributes {dimension_semantics = [#tpu.dimension_semantics<parallel>], iteration_bounds = array<i64: 2>, scalar_prefetch = 0 : i64, scratch_operands = 0 : i64, tpu.core_type = #tpu.core_type<tc>, window_params = [{transform_indices = @transform_0, window_bounds = array<i64: 1>}, {pipeline_mode = #tpu.pipeline_mode<synchronous>, transform_indices = @transform_1, window_bounds = array<i64: 384, 128>}, {transform_indices = @transform_2, window_bounds = array<i64: 32, 384>}, {transform_indices = @transform_3, window_bounds = array<i64: 32, 128>}]} {
    %c0 = arith.constant 0 : index
    %c0_0 = arith.constant 0 : index
    %0 = vector.load %arg3[%c0, %c0_0] : memref<32x384xf32, #tpu.memory_space<vmem>>, vector<32x384xf32>
    %c0_1 = arith.constant 0 : index
    %c0_2 = arith.constant 0 : index
    %1 = vector.load %arg2[%c0_1, %c0_2] : memref<384x128xf32, #tpu.memory_space<vmem>>, vector<384x128xf32>
    %cst = arith.constant dense<0.000000e+00> : vector<32x128xf32>
    %2 = tpu.matmul %0, %1, %cst {dimension_numbers = #tpu.dot_dimension_numbers<[1], [0], [0], [1], [0, 0, 1, 1], [], []>} : vector<32x384xf32>, vector<384x128xf32>, vector<32x128xf32> -> vector<32x128xf32>
    %c0_3 = arith.constant 0 : index
    %3 = memref.load %arg1[%c0_3] : memref<1xf32, #tpu.memory_space<smem>>
    %4 = vector.broadcast %3 : f32 to vector<32x128xf32>
    %5 = arith.addf %2, %4 : vector<32x128xf32>
    %c0_4 = arith.constant 0 : index
    %c0_5 = arith.constant 0 : index
    %6 = vector.load %arg4[%c0_4, %c0_5] : memref<32x128xf32, #tpu.memory_space<vmem>>, vector<32x128xf32>
    tpu.vector_store %arg4[%c0_4, %c0_5], %5 {strides = array<i32>} : memref<32x128xf32, #tpu.memory_space<vmem>>, vector<32x128xf32>,
    return
  }
  func.func @transform_0(%arg0: i32) -> i32 {
    %c0_i32 = arith.constant 0 : i32
    %c0_i32_0 = arith.constant 0 : i32
    return %c0_i32 : i32
  }
  func.func @transform_1(%arg0: i32) -> (i32, i32) {
    %c0_i32 = arith.constant 0 : i32
    %c0_i32_0 = arith.constant 0 : i32
    %c0_i32_1 = arith.constant 0 : i32
    return %c0_i32, %c0_i32_0 : i32, i32
  }
  func.func @transform_2(%arg0: i32) -> (i32, i32) {
    %c0_i32 = arith.constant 0 : i32
    %c0_i32_0 = arith.constant 0 : i32
    return %arg0, %c0_i32 : i32, i32
  }
  func.func @transform_3(%arg0: i32) -> (i32, i32) {
    %c0_i32 = arith.constant 0 : i32
    %c0_i32_0 = arith.constant 0 : i32
    return %arg0, %c0_i32 : i32, i32
  }
}

</mosaic_0001>

<bundles_post_ra>
// kernel: tpu_custom_call.1
= control target key start
LH: loop header
LB: loop body
LE: loop exit
PB: predicated region body
PF: predicated region fallthrough
CT: control target
= control target key end

     0   :  { %s1208_s0 = inlined_call_operand.<no memory space> [shape: f32[1], index: 0, kind: input, shape index: {}]   ;;  %s1209_s1 = inlined_call_operand.hbm [shape: f32[384,128], index: 1, kind: input, shape index: {}]   ;;  %s1210_s2 = inlined_call_operand.hbm [shape: f32[50,384], index: 2, kind: input, shape index: {}]   ;;  %s1211_s3 = inlined_call_operand.hbm [shape: f32[50,128], index: 3, kind: output, shape index: {}]  }
   0x1   :  { %8 = sst [smem:[#allocation2]] %s1208_s0 }
   0x2   :  { %9 = vsyncpa [#allocation4], 0 }
   0x3   :  { %10 = vsyncpa [#allocation7], 0 }
   0x4   :  { %12 = vsyncpa [#allocation7 + $0x1], 0 }
   0x5   :  { %13 = vsyncpa [#allocation5], 0 }
   0x6   :  { %15 = vsyncpa [#allocation5 + $0x1], 0  ;;  %s974_s14 = smov 0   ;;  %s976_s15 = smov 0  }
   0x7   :  { %s978_s16 = smov 0   ;;  %s980_s17 = smov 0  }
   0x8 LB: > { %s995_s0 = sadd.s32 4294967295, %s940_s17   ;;  %s565_s18 = sadd.s32 4294967294, %s940_s17   ;;  %s940_s17 = sphi %s980_s17, %s1231_s17   ;;  %s936_s16 = sphi %s978_s16, %s1230_s16   ;;  %s932_s15 = sphi %s976_s15, %s1229_s15   ;;  %s928_s14 = sphi %s974_s14, %s1228_s14  }
   0x9   : > { %s999_s19 = sadd.s32 1, %s940_s17   ;;  %s70_s20 = sadd.s32 1, %s936_s16 }
   0xa   : > { %s67_s21 = ssub.s32 %s940_s17, %s999_s19  ;;  %p77_p0 = scmp.ne.s32.totalorder %s936_s16, %s932_s15 }
   0xb   : > { %p68_p1 = scmp.eq.s32.totalorder %s67_s21, 0  ;;  %p78_p2 = scmp.eq.s32.totalorder %s940_s17, 0 }
   0xc   : > { %p83_p3 = scmp.ne.s32.totalorder %s932_s15, %s928_s14  ;;  %p1212_p4 = scmp.eq.s32.totalorder %s995_s0, 0 }
   0xd   : > { %s1011_s22 = scalar_select %p68_p1, %s936_s16, %s70_s20  }
   0xe   : > { %p1013_p5 = por %p78_p2, %p77_p0  ;;  %p1019_p6 = por %p1212_p4, %p83_p3 }
   0xf   : > { %p107_p7 = scmp.eq.s32.totalorder %s995_s0, 1  ;;  %p113_p8 = scmp.eq.s32.totalorder %s565_s18, 1 }
  0x10   : > { %s1215_s23 = scalar_select %p1013_p5, 1, 0 }
  0x11   : > { %s1216_s24 = scalar_select %p1019_p6, 1, 0 }
  0x12   : > { %p566_p9 = scmp.ge.s32.totalorder %s940_s17, 1  ;;  %p120_p10 = scmp.lt.s32.totalorder %s940_s17, 3 }
  0x13   : > { %p1026_p11 = por %p107_p7, %p77_p0  ;;  %p1030_p12 = por %p113_p8, %p83_p3 }
  0x14   : > { %p1034_p13 = pnand %p566_p9, %p120_p10  ;;  %s942_s28 = smov [#allocation3]  }
  0x15   : > { %s1217_s25 = scalar_select %p1026_p11, 1, 0 }
  0x16   : > { %s1218_s26 = scalar_select %p1030_p12, 1, 0 }
  0x17   : > { %s1219_s27 = scalar_select %p1034_p13, 1, 0 }
  0x18   : > { %p764_p1 = pneg %p1034_p13  ;;  %s135_s29 = sshll.u32 %s942_s28, 4  ;;  %s136_s29 = int_to_ptr.vmem [resolvable:$true] %s135_s29 }
  0x19   : > { %s814_s6 = scalar_lea.hbm %s1209_s1, 6144 }
  0x1a   : > { %p1042_p2 = pnand %p764_p1, %p1212_p4  ;;  %p815_p0 = scmp.ne.s32.totalorder %s1209_s1, %s814_s6 }
  0x1b   : > { %p821_p9 = scmp.lt.u32.totalorder %s814_s6, %s1209_s1 }
  0x1c   : > { %p816_p3 = pneg %p1042_p2 }
  0x1e   : > { %p817_p7 = pnand %p816_p3, %p815_p0 }
  0x20   : > { %p818_p8 = pneg %p817_p7 }
  0x22   : > { %p823_p10 = pnand %p821_p9, %p818_p8 }
  0x24   : > { %826 = shalt.err (!%p823_p10)
}
  0x25   : > { %s827_s11 = scalar_lea.vmem %s136_s29, 6144  ;;  %p835_p11 = scmp.lt.s32.totalorder %s136_s29, %s136_s29 }
  0x26   : > { %p828_p1 = scmp.ne.s32.totalorder %s136_s29, %s827_s11  ;;  %p836_p6 = scmp.lt.s32.totalorder %s827_s11, %s827_s11 }
  0x28   : > { %p830_p4 = pnand %p828_p1, %p816_p3  ;;  %p837_p13 = por %p836_p6, %p835_p11 }
  0x2a   : > { %p831_p12 = pneg %p830_p4 }
  0x2c   : > { %p838_p5 = pnand %p837_p13, %p831_p12 }
  0x2e   : > { %841 = shalt.err (!%p838_p5)
}
  0x2f   : > { %s943_s12 = smov 128   ;;  %s944_s13 = smov 8  }
  0x30   : > { %767 = dma.hbm_to_vmem [thread:$0]  (!%p1042_p2), %s1209_s1, 6144, %s136_s29, [#allocation4], %s943_s12, %s943_s12, %s944_s13  }
  0x31   : > { %p568_p0 = scmp.ge.s32.totalorder %s940_s17, 2 }
  0x32   : > { %p1221_p4 = scmp.ne.s32.totalorder (!%p568_p0), %s1215_s23, 0 }
  0x33   : > { %145 = sbr.rel (%p568_p0) target bundleno = 94 (0x5e), region = 24 }
  0x3a   : > { %148 = sbr.rel (!%p1221_p4) target bundleno = 94 (0x5e), region = 28  ;;  %s149_s21 = sand.u32 (%p1221_p4), 1, %s936_s16  }
  0x3b   : > { %s569_s28 = sshll.u32 (%p1221_p4), %s940_s17, 2  ;;  %s755_s4 = smul.u32 (%p1221_p4), 96, %s149_s21 }
  0x3c   : > { %s155_s5 = ssub.s32 (%p1221_p4), 7, %s569_s28  ;;  %s1072_s6 = scalar_lea.sflag (%p1221_p4), [#allocation7], %s149_s21 }
  0x3d   : > { %p156_p5 = scmp.lt.s32.totalorder (%p1221_p4), %s155_s5, 4  ;;  %s153_s7 = scalar_lea.vmem (%p1221_p4), [#allocation6], %s755_s4 }
  0x41   : > { %s1233_s5 = smov (!%p156_p5, %s155_s5), 4 }
  0x42   : > { %s1069_s30 = smul.u32 384, %s1233_s5 }
  0x44   : > { %s161_s29 = ssub.s32 1536, %s1069_s30 }
  0x45   : > { %162 = vsyncadd %s1072_s6, %s161_s29  ;;  %p572_p6 = scmp.ne.s32.totalorder %s1069_s30, 0  ;;  %s756_s23 = smul.u32 1536, %s940_s17 }
  0x46   : > { %s168_s8 = sshll.u32 %s153_s7, 4  ;;  %s846_s20 = scalar_lea.hbm %s1210_s2, 2688  ;;  %s1082_s8 = int_to_ptr.vmem [resolvable:$true] %s168_s8 }
  0x47   : > { %s1080_s11 = scalar_lea.hbm %s1210_s2, %s756_s23 }
  0x48   : > { %s842_s12 = scalar_lea.hbm %s1080_s11, %s1069_s30  ;;  %p847_p2 = scmp.lt.u32.totalorder %s1080_s11, %s1210_s2 }
  0x49   : > { %p843_p11 = scmp.ne.s32.totalorder %s1080_s11, %s842_s12  ;;  %p848_p3 = scmp.lt.u32.totalorder %s846_s20, %s842_s12 }
  0x4a   : > { %p850_p8 = scmp.lt.u32.totalorder %s842_s12, %s1080_s11 }
  0x4b   : > { %p844_p12 = pnand %p843_p11, %p572_p6  ;;  %p849_p7 = por %p848_p3, %p847_p2 }
  0x4d   : > { %p845_p13 = pneg %p844_p12  ;;  %p851_p9 = por %p850_p8, %p849_p7 }
  0x4f   : > { %p852_p10 = pnand %p851_p9, %p845_p13 }
  0x51   : > { %855 = shalt.err (!%p852_p10)
}
  0x52   : > { %s856_s4 = scalar_lea.vmem %s1082_s8, %s1069_s30  ;;  %s945_s5 = smov [#allocation6]  }
  0x53   : > { %p857_p1 = scmp.ne.s32.totalorder %s1082_s8, %s856_s4  ;;  %s860_s29 = sshll.u32 %s945_s5, 4  ;;  %s861_s29 = int_to_ptr.vmem [resolvable:$false] %s860_s29 }
  0x54   : > { %s862_s7 = scalar_lea.vmem %s861_s29, 3072  ;;  %p863_p11 = scmp.lt.s32.totalorder %s1082_s8, %s861_s29 }
  0x55   : > { %p858_p4 = pnand %p857_p1, %p572_p6  ;;  %p864_p12 = scmp.lt.s32.totalorder %s862_s7, %s856_s4 }
  0x57   : > { %p859_p5 = pneg %p858_p4  ;;  %p865_p2 = por %p864_p12, %p863_p11 }
  0x59   : > { %p866_p3 = pnand %p865_p2, %p859_p5 }
  0x5b   : > { %869 = shalt.err (!%p866_p3)
}
  0x5c   : > { %s946_s23 = smov 384   ;;  %s947_s9 = smov 24  }
  0x5d   : > { %174 = dma.hbm_to_vmem [thread:$0]  (%p572_p6), %s1080_s11, %s1069_s30, %s1082_s8, %s1072_s6, %s946_s23, %s946_s23, %s947_s9  }
  0x5e PF: > { %p1222_p13 = scmp.ne.s32.totalorder %s1219_s27, 0 }
  0x5f   : > { %p1223_p7 = scmp.eq.s32.totalorder (!%p1222_p13), %s995_s0, 0 }
  0x60   : > { %180 = sbr.rel (%p1222_p13) target bundleno = 404 (0x194), region = 32 }
  0x67   : > { %915 = dma.done.wait (%p1223_p7), [#allocation4], 6144   ;;  %p1224_p8 = pmov %p1223_p7 }
  0x68   : > { %s1116_s10 = sand.u32 1, %s932_s15   ;;  %p1225_p6 = scmp.ne.s32.totalorder %s1216_s24, 0 }
  0x69   : > { %917 = vsyncadd (%p1224_p8), [#allocation4], 4294961152  ;;  %s757_s12 = smul.u32 96, %s1116_s10  ;;  %s187_s13 = scalar_lea.sflag [#allocation7], %s1116_s10 }
  0x6b   : > { %s1120_s30 = scalar_lea.vmem [#allocation6], %s757_s12 }
  0x6c   : > { %919 = dma.done.wait (%p1225_p6), %s187_s13, 1536  }
  0x6d   : > { %921 = vsyncadd (%p1225_p6), %s187_s13, 4294965760  ;;  %v252_v0 = vld [vmem:[#allocation3 + $0x80] sm:$0xff]  ;;  %v253_v1 = vld [vmem:[#allocation3 + $0x88] sm:$0xff]  ;;  %s284_s24 = sld [smem:[#allocation2]]  ;;  %s578_s27 = sshll.u32 %s1116_s10, 5 }
  0x6e   : > { %v236_v2 = vld [vmem:[#allocation3] sm:$0xff]  ;;  %v691_v3 = vpack.c.bf16 %v253_v1, %v252_v0  ;;  %v237_v4 = vld [vmem:[#allocation3 + $0x8] sm:$0xff]  ;;  %v254_v5 = vld [vmem:[#allocation3 + $0x90] sm:$0xff]  ;;  %s1139_s6 = scalar_lea.vmem [#allocation8], %s578_s27  ;;  %s461_s8 = scalar_lea.sflag [#allocation5], %s1116_s10 }
  0x6f   : > { %v255_v6 = vld [vmem:[#allocation3 + $0x98] sm:$0xff]  ;;  %v693_v7 = vpack.c.bf16 %v237_v4, %v236_v2  ;;  %v268_v9 = vld [vmem:[#allocation3 + $0x100] sm:$0xff]  ;;  %v269_v10 = vld [vmem:[#allocation3 + $0x108] sm:$0xff]  ;;  %p1226_p9 = scmp.ne.s32.totalorder %s1217_s25, 0 }
  0x70   : > { %v695_v8 = vpack.c.bf16 %v255_v6, %v254_v5  ;;  %v238_v11 = vld [vmem:[#allocation3 + $0x10] sm:$0xff]  ;;  %692 = vmatprep.subr.bf16.mxu0 %v691_v3  ;;  %v723_v12 = vpack.c.bf16 %v269_v10, %v268_v9  ;;  %v239_v13 = vld [vmem:[#allocation3 + $0x18] sm:$0xff]  ;;  %v256_v14 = vld [vmem:[#allocation3 + $0xa0] sm:$0xff]  ;;  %s580_s11 = sshll.u32 (%p1226_p9), %s995_s0, 2 }
  0x71   : > { %v257_v15 = vld [vmem:[#allocation3 + $0xa8] sm:$0xff]  ;;  %694 = vmatpush3.bf16.msra.mxu0 %v693_v7  ;;  %v697_v16 = vpack.c.bf16 %v239_v13, %v238_v11  ;;  %v270_v17 = vld [vmem:[#allocation3 + $0x110] sm:$0xff]  ;;  %v271_v18 = vld [vmem:[#allocation3 + $0x118] sm:$0xff]  ;;  %s469_s18 = ssub.s32 (%p1226_p9), 7, %s580_s11 }
  0x72   : > { %696 = vmatprep.subr.bf16.mxu0 %v695_v8  ;;  %724 = vmatprep.subr.bf16.mxu1 %v723_v12  ;;  %v699_v19 = vpack.c.bf16 %v257_v15, %v256_v14  ;;  %v727_v20 = vpack.c.bf16 %v271_v18, %v270_v17  ;;  %v240_v21 = vld [vmem:[#allocation3 + $0x20] sm:$0xff]  ;;  %v241_v22 = vld [vmem:[#allocation3 + $0x28] sm:$0xff]  ;;  %v258_v23 = vld [vmem:[#allocation3 + $0xb0] sm:$0xff]  ;;  %p470_p10 = scmp.lt.s32.totalorder (%p1226_p9), %s469_s18, 4 }
  0x73   : > { %726 = vmatpush3.bf16.msra.mxu1 %v723_v12  ;;  %v259_v24 = vld [vmem:[#allocation3 + $0xb8] sm:$0xff]  ;;  %v272_v25 = vld [vmem:[#allocation3 + $0x120] sm:$0xff]  ;;  %v273_v26 = vld [vmem:[#allocation3 + $0x128] sm:$0xff]  ;;  %v701_v28 = vpack.c.bf16 %v241_v22, %v240_v21  ;;  %v285_v22 = vstv %s284_s24 }
  0x74   : > { %728 = vmatprep.subr.bf16.mxu1 %v727_v20  ;;  %v731_v27 = vpack.c.bf16 %v273_v26, %v272_v25  ;;  %v274_v29 = vld [vmem:[#allocation3 + $0x130] sm:$0xff]  ;;  %v275_v30 = vld [vmem:[#allocation3 + $0x138] sm:$0xff]  ;;  %v703_v31 = vpack.c.bf16 %v259_v24, %v258_v23  ;;  %v260_v34 = vld [vmem:[#allocation3 + $0xc0] sm:$0xff] }
  0x75   : > { %698 = vmatpush3.bf16.msra.mxu0 %v697_v16  ;;  %v242_v32 = vld [vmem:[#allocation3 + $0x30] sm:$0xff]  ;;  %v243_v33 = vld [vmem:[#allocation3 + $0x38] sm:$0xff]  ;;  %v261_v35 = vld [vmem:[#allocation3 + $0xc8] sm:$0xff]  ;;  %v735_v36 = vpack.c.bf16 %v275_v30, %v274_v29 }
  0x76   : > { %700 = vmatprep.subr.bf16.mxu0 %v699_v19  ;;  %v705_v37 = vpack.c.bf16 %v243_v33, %v242_v32  ;;  %v276_v38 = vld [vmem:[#allocation3 + $0x140] sm:$0xff]  ;;  %v277_v39 = vld [vmem:[#allocation3 + $0x148] sm:$0xff]  ;;  %v707_v40 = vpack.c.bf16 %v261_v35, %v260_v34  ;;  %v262_v43 = vld [vmem:[#allocation3 + $0xd0] sm:$0xff] }
  0x77   : > { %730 = vmatpush3.bf16.msra.mxu1 %v727_v20  ;;  %v244_v41 = vld [vmem:[#allocation3 + $0x40] sm:$0xff]  ;;  %v245_v42 = vld [vmem:[#allocation3 + $0x48] sm:$0xff]  ;;  %v263_v44 = vld [vmem:[#allocation3 + $0xd8] sm:$0xff]  ;;  %v739_v45 = vpack.c.bf16 %v277_v39, %v276_v38 }
  0x78   : > { %732 = vmatprep.subr.bf16.mxu1 %v731_v27  ;;  %v225_v46 = vld [vmem:[%s1120_s30 + $0x8] sm:$0xff]  ;;  %v709_v47 = vpack.c.bf16 %v245_v42, %v244_v41  ;;  %v278_v48 = vld [vmem:[#allocation3 + $0x150] sm:$0xff]  ;;  %v279_v49 = vld [vmem:[#allocation3 + $0x158] sm:$0xff]  ;;  %v711_v50 = vpack.c.bf16 %v263_v44, %v262_v43 }
  0x79   : > { %702 = vmatpush3.bf16.msra.mxu0 %v701_v28  ;;  %350 = vmatprep.mubr.f32.mxu0 %v225_v46  ;;  %v246_v51 = vld [vmem:[#allocation3 + $0x50] sm:$0xff]  ;;  %v247_v52 = vld [vmem:[#allocation3 + $0x58] sm:$0xff]  ;;  %v264_v54 = vld [vmem:[#allocation3 + $0xe0] sm:$0xff]  ;;  %v743_v56 = vpack.c.bf16 %v279_v49, %v278_v48 }
  0x7a   : > { %704 = vmatprep.subr.bf16.mxu0 %v703_v31  ;;  %v226_v53 = vld [vmem:[%s1120_s30 + $0x10] sm:$0xff]  ;;  %v265_v55 = vld [vmem:[#allocation3 + $0xe8] sm:$0xff]  ;;  %v713_v57 = vpack.c.bf16 %v247_v52, %v246_v51  ;;  %v280_v58 = vld [vmem:[#allocation3 + $0x160] sm:$0xff] }
  0x7b   : > { %734 = vmatpush3.bf16.msra.mxu1 %v731_v27  ;;  %685 = vmatprep.mubr.f32.mxu1 %v226_v53  ;;  %v281_v59 = vld [vmem:[#allocation3 + $0x168] sm:$0xff]  ;;  %v715_v60 = vpack.c.bf16 %v265_v55, %v264_v54  ;;  %v248_v61 = vld [vmem:[#allocation3 + $0x60] sm:$0xff]  ;;  %v266_v63 = vld [vmem:[#allocation3 + $0xf0] sm:$0xff] }
  0x7c   : > { %736 = vmatprep.subr.bf16.mxu1 %v735_v36  ;;  %v249_v62 = vld [vmem:[#allocation3 + $0x68] sm:$0xff]  ;;  %v267_v0 = vld [vmem:[#allocation3 + $0xf8] sm:$0xff]  ;;  %v747_v1 = vpack.c.bf16 %v281_v59, %v280_v58  ;;  %v282_v3 = vld [vmem:[#allocation3 + $0x170] sm:$0xff] }
  0x7d   : > { %706 = vmatpush3.bf16.msra.mxu0 %v705_v37  ;;  %v717_v2 = vpack.c.bf16 %v249_v62, %v248_v61  ;;  %v283_v4 = vld [vmem:[#allocation3 + $0x178] sm:$0xff]  ;;  %v719_v5 = vpack.c.bf16 %v267_v0, %v266_v63  ;;  %v250_v6 = vld [vmem:[#allocation3 + $0x70] sm:$0xff]  ;;  %v224_v10 = vld [vmem:[%s1120_s30] sm:$0xff] }
  0x7e   : > { %708 = vmatprep.subr.bf16.mxu0 %v707_v40  ;;  %v251_v7 = vld [vmem:[#allocation3 + $0x78] sm:$0xff]  ;;  %v751_v8 = vpack.c.bf16 %v283_v4, %v282_v3  ;;  %v228_v11 = vld [vmem:[%s1120_s30 + $0x20] sm:$0xff]  ;;  %v229_v12 = vld [vmem:[%s1120_s30 + $0x28] sm:$0xff] }
  0x7f   : > { %738 = vmatpush3.bf16.msra.mxu1 %v735_v36  ;;  %v721_v9 = vpack.c.bf16 %v251_v7, %v250_v6  ;;  %v232_v13 = vld [vmem:[%s1120_s30 + $0x40] sm:$0xff]  ;;  %v227_v14 = vld [vmem:[%s1120_s30 + $0x18] sm:$0xff]  ;;  %v230_v17 = vld [vmem:[%s1120_s30 + $0x30] sm:$0xff] }
  0x80   : > { %740 = vmatprep.subr.bf16.mxu1 %v739_v45  ;;  %v231_v15 = vld [vmem:[%s1120_s30 + $0x38] sm:$0xff]  ;;  %v234_v18 = vld [vmem:[%s1120_s30 + $0x50] sm:$0xff]  ;;  %v233_v19 = vld [vmem:[%s1120_s30 + $0x48] sm:$0xff] }
  0x81   : > { %710 = vmatpush3.bf16.msra.mxu0 %v709_v47  ;;  %v235_v16 = vld [vmem:[%s1120_s30 + $0x58] sm:$0xff] }
  0x82   : > { %712 = vmatprep.subr.bf16.mxu0 %v711_v50 }
  0x83   : > { %742 = vmatpush3.bf16.msra.mxu1 %v739_v45 }
  0x84   : > { %744 = vmatprep.subr.bf16.mxu1 %v743_v56 }
  0x85   : > { %714 = vmatpush3.bf16.msra.mxu0 %v713_v57 }
  0x86   : > { %716 = vmatprep.subr.bf16.mxu0 %v715_v60 }
  0x87   : > { %746 = vmatpush3.bf16.msra.mxu1 %v743_v56 }
  0x88   : > { %748 = vmatprep.subr.bf16.mxu1 %v747_v1 }
  0x89   : > { %718 = vmatpush3.bf16.msra.mxu0 %v717_v2 }
  0x8a   : > { %720 = vmatprep.subr.bf16.mxu0 %v719_v5 }
  0x8b   : > { %750 = vmatpush3.bf16.msra.mxu1 %v747_v1 }
  0x8c   : > { %752 = vmatprep.subr.bf16.mxu1 %v751_v8 }
  0x8d   : > { %722 = vmatpush3.bf16.msra.mxu0 %v721_v9 }
  0x8f   : > { %754 = vmatpush3.bf16.msra.mxu1 %v751_v8 }
  0x90   : > { %351 = vmatmul.mubr.f32.vlgmr.msra.gmra.mrb[0].mxu0 %v224_v10 }
  0x91   : > { %355 = vmatprep.mubr.f32.mxu0 %v228_v11 }
  0x92   : > { %686 = vmatmul.mubr.f32.vlgmr.msra.gmra.mrb[0].mxu1 %v229_v12 }
  0x93   : > { %688 = vmatprep.mubr.f32.mxu1 %v232_v13 }
  0x94   : > { %356 = vmatmul.mubr.f32.gmra.mrb[2].mxu0 %v227_v14 }
  0x95   : > { %360 = vmatprep.mubr.f32.mxu0 %v231_v15 }
  0x96   : > { %689 = vmatmul.mubr.f32.gmra.mrb[2].mxu1 %v235_v16 }
  0x98   : > { %361 = vmatmul.mubr.f32.gmra.mrb[4].mxu0 %v230_v17 }
  0x99   : > { %365 = vmatprep.mubr.f32.mxu0 %v234_v18 }
  0x9c   : > { %366 = vmatmul.mubr.f32.gmra.mrb[6].mxu0 %v233_v19 }
 0x163   : > { %v621_v20 = vpop.f32.mrb[0].mxu0 }
 0x164   : > { %v622_v21 = vpop.f32.mrb[1].mxu0 }
 0x165   : > { %v623_v23 = vadd.f32 %v622_v21, %v621_v20  ;;  %v687_v24 = vpop.f32.mrb[0].mxu1 }
 0x166   : > { %v437_v25 = vpop.f32.mrb[1].mxu1 }
 0x167   : > { %v624_v26 = vpop.f32.mrb[2].mxu0  ;;  %v353_v27 = vadd.f32 %v623_v23, %v285_v22 }
 0x168   : > { %v625_v28 = vpop.f32.mrb[3].mxu0 }
 0x169   : > { %v626_v29 = vadd.f32 %v625_v28, %v624_v26  ;;  %v438_v30 = vadd.f32 %v437_v25, %v353_v27  ;;  %v690_v31 = vpop.f32.mrb[2].mxu1 }
 0x16a   : > { %v447_v32 = vpop.f32.mrb[3].mxu1 }
 0x16b   : > { %v358_v33 = vadd.f32 %v626_v29, %v285_v22  ;;  %456 = vst [vmem:[%s1139_s6] sm:$0xff] %v438_v30  ;;  %v627_v34 = vpop.f32.mrb[4].mxu0 }
 0x16c   : > { %v628_v35 = vpop.f32.mrb[5].mxu0 }
 0x16d   : > { %v443_v36 = vadd.f32 %v687_v24, %v358_v33  ;;  %v629_v37 = vadd.f32 %v628_v35, %v627_v34 }
 0x16f   : > { %457 = vst [vmem:[%s1139_s6 + $0x8] sm:$0xff] %v443_v36  ;;  %v630_v38 = vpop.f32.mrb[6].mxu0  ;;  %v363_v39 = vadd.f32 %v629_v37, %v285_v22 }
 0x170   : > { %v631_v40 = vpop.f32.mrb[7].mxu0 }
 0x171   : > { %v632_v41 = vadd.f32 %v631_v40, %v630_v38  ;;  %v448_v42 = vadd.f32 %v447_v32, %v363_v39  ;;  %467 = sbr.rel (!%p1226_p9) target bundleno = 404 (0x194), region = 44 }
 0x173   : > { %v368_v43 = vadd.f32 %v632_v41, %v285_v22  ;;  %458 = vst [vmem:[%s1139_s6 + $0x10] sm:$0xff] %v448_v42 }
 0x175   : > { %v453_v44 = vadd.f32 %v690_v31, %v368_v43 }
 0x177   : > { %459 = vst [vmem:[%s1139_s6 + $0x18] sm:$0xff] %v453_v44 }
 0x178   : > { %s1235_s18 = smov (!%p470_p10, %s469_s18), 4 }
 0x179   : > { %s1149_s20 = sshll.u32 %s1235_s18, 7 }
 0x17a   : > { %s474_s21 = ssub.s32 512, %s1149_s20 }
 0x17b   : > { %475 = vsyncadd %s461_s8, %s474_s21  ;;  %p582_p1 = scmp.ne.s32.totalorder %s1149_s20, 0  ;;  %s588_s25 = sshll.u32 %s995_s0, 9 }
 0x17c   : > { %s1159_s5 = scalar_lea.hbm %s1211_s3, %s588_s25  ;;  %s480_s29 = sshll.u32 %s1139_s6, 4  ;;  %s1162_s29 = int_to_ptr.vmem [resolvable:$true] %s480_s29 }
 0x17d   : > { %s870_s7 = scalar_lea.vmem %s1162_s29, %s1149_s20  ;;  %s948_s23 = smov [#allocation8]  }
 0x17e   : > { %p871_p4 = scmp.ne.s32.totalorder %s1162_s29, %s870_s7  ;;  %s874_s9 = sshll.u32 %s948_s23, 4  ;;  %s875_s9 = int_to_ptr.vmem [resolvable:$false] %s874_s9 }
 0x17f   : > { %s876_s0 = scalar_lea.vmem %s875_s9, 1024  ;;  %p877_p12 = scmp.lt.s32.totalorder %s1162_s29, %s875_s9 }
 0x180   : > { %p872_p5 = pnand %p871_p4, %p582_p1  ;;  %p878_p2 = scmp.lt.s32.totalorder %s876_s0, %s870_s7 }
 0x182   : > { %p873_p11 = pneg %p872_p5  ;;  %p879_p3 = por %p878_p2, %p877_p12 }
 0x184   : > { %p880_p13 = pnand %p879_p3, %p873_p11 }
 0x186   : > { %883 = shalt.err (!%p880_p13)
}
 0x187   : > { %s884_s12 = scalar_lea.hbm %s1159_s5, %s1149_s20  ;;  %s888_s24 = scalar_lea.hbm %s1211_s3, 896 }
 0x188   : > { %p885_p7 = scmp.ne.s32.totalorder %s1159_s5, %s884_s12  ;;  %p889_p9 = scmp.lt.u32.totalorder %s1159_s5, %s1211_s3 }
 0x189   : > { %p890_p10 = scmp.lt.u32.totalorder %s888_s24, %s884_s12  ;;  %p892_p5 = scmp.lt.u32.totalorder %s884_s12, %s1159_s5 }
 0x18a   : > { %p886_p8 = pnand %p885_p7, %p582_p1 }
 0x18b   : > { %p891_p4 = por %p890_p10, %p889_p9 }
 0x18c   : > { %p887_p6 = pneg %p886_p8 }
 0x18d   : > { %p893_p11 = por %p892_p5, %p891_p4 }
 0x18f   : > { %p894_p12 = pnand %p893_p11, %p887_p6 }
 0x191   : > { %897 = shalt.err (!%p894_p12)
}
 0x192   : > { %s949_s11 = smov 128   ;;  %s950_s18 = smov 8  }
 0x193   : > { %486 = dma.vmem_to_hbm [thread:$0]  (%p582_p1), %s1162_s29, %s1149_s20, %s1159_s5, %s461_s8, %s949_s11, %s949_s11, %s950_s18  }
 0x194 PF: > { %s495_s21 = sand.u32 1, %s928_s14   ;;  %p1227_p2 = scmp.ne.s32.totalorder %s1218_s26, 0 }
 0x195   : > { %s496_s25 = scalar_lea.sflag [#allocation5], %s495_s21 }
 0x196   : > { %p769_p3 = pnand %p568_p0, %p1227_p2 }
 0x198   : > { %923 = dma.done.wait (!%p769_p3), %s496_s25, 512  }
 0x199   : > { %925 = vsyncadd (!%p769_p3), %s496_s25, 4294966784  ;;  %p18_p13 = scmp.ge.s32.totalorder %s999_s19, 4   ;;  %s1228_s14 = smov %s932_s15 }
 0x19a   : > { %s1229_s15 = smov %s936_s16  ;;  %s1230_s16 = smov %s1011_s22 }
 0x19b   : > { %s1231_s17 = smov %s999_s19  ;;  %20 = sbr.rel (!%p18_p13) target bundleno = 8 (0x8), region = 82 }
 0x1a2   :  { %501 = vsyncpa [#allocation4], 1 }
 0x1a3   :  { %503 = vsyncpa [#allocation4 + $0x1], 1 }
 0x1a4   :  { %504 = vsyncpa [#allocation7], 1 }
 0x1a5   :  { %506 = vsyncpa [#allocation7 + $0x1], 1 }
 0x1a6   :  { %507 = vsyncpa [#allocation5], 1 }
 0x1a7   :  { %509 = vsyncpa [#allocation5 + $0x1], 1 }

</bundles_post_ra>
